<compile_context>
chip_gen: v7x
topology: tpu7x:2x2x1
jax: 0.10.0
libtpu: 0.0.40
codegen_flags: <defaults>
</compile_context>

<pallas_src>
import functools

import jax
import jax.numpy as jnp
from jax.experimental import pallas as pl
from jax.experimental.pallas import tpu as pltpu


def _round_up(x: int, m: int) -> int:
    return ((x + m - 1) // m) * m


def _adjoint_loss_kernel(x_ref, tgt_ref, out_ref, *, alpha: float, batch: int,
                         row_tile: int, masked: bool):
    """One grid step: rows [i*row_tile, (i+1)*row_tile) of both branches."""
    x1 = x_ref[0].astype(jnp.float32)          # (TB, C) branch-1 logits
    x2 = x_ref[1].astype(jnp.float32)          # (TB, C) branch-2 logits
    tb, c = x1.shape

    # --- branch 1: log_softmax & softmax ------------------------------------
    m1 = jnp.max(x1, axis=-1, keepdims=True)
    e1 = jnp.exp(x1 - m1)
    s1 = jnp.sum(e1, axis=-1, keepdims=True)
    log_p1 = (x1 - m1) - jnp.log(s1)           # log_softmax(output[:B])
    p1 = e1 * pl.reciprocal(s1, approx=False)  # softmax(output[:B])

    # --- branch 2: softmax ----------------------------------------------------
    m2 = jnp.max(x2, axis=-1, keepdims=True)
    e2 = jnp.exp(x2 - m2)
    s2 = jnp.sum(e2, axis=-1, keepdims=True)
    p2 = e2 * pl.reciprocal(s2, approx=False)  # softmax(output[B:])

    # --- NLL gather (select; negation folded into the combined term) ----------
    tgt = tgt_ref[...]                          # (TB, 1) int32
    cls_ids = jax.lax.broadcasted_iota(jnp.int32, (tb, c), 1)
    gathered = jnp.where(cls_ids == tgt, log_p1, jnp.float32(0.0))   # (TB, C)

    # --- KL-style divergence (reference-exact epsilon placement) --------------
    kl_elem = p1 * jnp.log(1e-6 + p1 * pl.reciprocal(p2 + 1e-6, approx=False))

    if alpha == 1.0:
        elem = kl_elem - gathered
    else:
        elem = jnp.float32(alpha) * kl_elem - gathered

    if masked:  # static: only compiled in when the last row tile overhangs `batch`
        row_ids = (pl.program_id(0) * row_tile
                   + jax.lax.broadcasted_iota(jnp.int32, (tb, 1), 0))
        elem = jnp.where(row_ids < batch, elem, jnp.float32(0.0))

    # Single fused sublane reduction -> lane-wide (1, C) per-block partial.
    out_ref[0] = jnp.sum(elem, axis=0, keepdims=True)


def _pick_row_tile(b: int, c: int, itemsize: int,
                   vmem_budget_bytes: int = 24 * 1024 * 1024) -> int:
    """Largest multiple-of-8 row tile under the VMEM budget (<= 1024 rows)."""
    per_row = (4 * c * itemsize      # (2, tb, C) logits tile, double-buffered
               + 40 * c              # ~10 live (tb, C) f32 intermediates
               + 2 * 128 * 4)        # (tb, 1) int32 targets pad lanes to 128, x2 bufs
    cap = max(8, vmem_budget_bytes // per_row)
    tb = min(cap, 1024, _round_up(b, 8))
    return max(8, (tb // 8) * 8)


def adjoint_loss(output: jax.Array, target: jax.Array, alpha: float = 1.0) -> jax.Array:
    """Pallas implementation of AdjointLoss.forward(output, target)."""
    l, c = output.shape
    assert l % 2 == 0, "output must have an even number of rows"
    b = l // 2

    tb = _pick_row_tile(b, c, jnp.dtype(output.dtype).itemsize)
    nb = (b + tb - 1) // tb
    b_pad = nb * tb
    pad = b_pad - b

    # View both branches as a stacked (2, B, C) array (single input stream).
    x = output.reshape(2, b, c)
    tgt = target.astype(jnp.int32)
    if pad:
        x = jnp.pad(x, ((0, 0), (0, pad), (0, 0)))
        tgt = jnp.pad(tgt, (0, pad))
    tgt2d = tgt.reshape(b_pad, 1)

    kernel = functools.partial(_adjoint_loss_kernel, alpha=alpha, batch=b,
                               row_tile=tb, masked=(pad > 0))

    partials = pl.pallas_call(
        kernel,
        out_shape=jax.ShapeDtypeStruct((nb, 1, c), jnp.float32),
        grid_spec=pltpu.PrefetchScalarGridSpec(
            num_scalar_prefetch=0,
            grid=(nb,),
            in_specs=[
                # both branches for row tile i: (2, tb, C)
                pl.BlockSpec((2, tb, c), lambda i: (0, i, 0)),
                # targets for this row tile
                pl.BlockSpec((tb, 1), lambda i: (i, 0)),
            ],
            out_specs=pl.BlockSpec((1, 1, c), lambda i: (i, 0, 0)),
        ),
        compiler_params=pltpu.CompilerParams(
            # Independent per-block partials -> both TensorCores can share the grid.
            dimension_semantics=("parallel",),
            vmem_limit_bytes=48 * 1024 * 1024,
        ),
    )(x, tgt2d)

    return jnp.sum(partials) / b


def _reference(output, target, alpha=1.0):
    """Pure-JAX reference mirroring the PyTorch module."""
    l, _ = output.shape
    b = l // 2
    x1 = output[:b]
    x2 = output[b:]
    log_preds1 = jax.nn.log_softmax(x1, axis=-1)
    nll1 = -jnp.mean(jnp.take_along_axis(log_preds1, target[:, None], axis=1))
    prob1 = jax.nn.softmax(x1, axis=-1)
    prob2 = jax.nn.softmax(x2, axis=-1)
    kl = jnp.sum(prob1 * jnp.log(1e-6 + prob1 / (prob2 + 1e-6)), axis=1)
    return nll1 + alpha * jnp.mean(kl)


if __name__ == "__main__":
    key = jax.random.PRNGKey(0)
    k_out, k_tgt = jax.random.split(key)

    B = 20           # per-branch batch (deliberately NOT a multiple of 8: tests the tail mask)
    C = 32           # number of classes
    L = 2 * B        # total rows in `output`

    output = jax.random.normal(k_out, (L, C), dtype=jnp.float32)
    target = jax.random.randint(k_tgt, (B,), 0, C, dtype=jnp.int32)

    loss = adjoint_loss(output, target, alpha=1.0)
    loss = jax.block_until_ready(loss)

    ref = _reference(output, target, alpha=1.0)
    assert jnp.allclose(loss, ref, rtol=1e-5, atol=1e-5), (loss, ref)

    print("KERNEL_OK")
</pallas_src>

<mosaic_0001>
module attributes {stable_mosaic.version = 11 : i64} {
  func.func @_adjoint_loss_kernel(%arg0: i32, %arg1: memref<2x24x32xf32, #tpu.memory_space<vmem>>, %arg2: memref<24x1xi32, #tpu.memory_space<vmem>>, %arg3: memref<1x1x32xf32, #tpu.memory_space<vmem>>) attributes {dimension_semantics = [#tpu.dimension_semantics<parallel>], iteration_bounds = array<i64: 1>, scalar_prefetch = 0 : i64, scratch_operands = 0 : i64, tpu.core_type = #tpu.core_type<tc>, window_params = [{transform_indices = @transform_0, window_bounds = array<i64: 2, 24, 32>}, {transform_indices = @transform_1, window_bounds = array<i64: 24, 1>}, {transform_indices = @transform_2, window_bounds = array<i64: 1, 1, 32>}]} {
    %c0 = arith.constant 0 : index
    %c0_0 = arith.constant 0 : index
    %c0_1 = arith.constant 0 : index
    %0 = vector.load %arg1[%c0, %c0_0, %c0_1] : memref<2x24x32xf32, #tpu.memory_space<vmem>>, vector<1x24x32xf32>
    %1 = vector.shape_cast %0 : vector<1x24x32xf32> to vector<24x32xf32>
    %c1 = arith.constant 1 : index
    %c0_2 = arith.constant 0 : index
    %c0_3 = arith.constant 0 : index
    %2 = vector.load %arg1[%c1, %c0_2, %c0_3] : memref<2x24x32xf32, #tpu.memory_space<vmem>>, vector<1x24x32xf32>
    %3 = vector.shape_cast %2 : vector<1x24x32xf32> to vector<24x32xf32>
    %cst = arith.constant dense<0xFF800000> : vector<24xf32>
    %4 = vector.multi_reduction <maximumf>, %1, %cst [1] : vector<24x32xf32> to vector<24xf32>
    %5 = vector.shape_cast %4 : vector<24xf32> to vector<24x1xf32>
    %6 = vector.broadcast %5 : vector<24x1xf32> to vector<24x32xf32>
    %7 = arith.subf %1, %6 : vector<24x32xf32>
    %8 = math.exp %7 : vector<24x32xf32>
    %cst_4 = arith.constant dense<0.000000e+00> : vector<24xf32>
    %9 = vector.multi_reduction <add>, %8, %cst_4 [1] : vector<24x32xf32> to vector<24xf32>
    %10 = vector.shape_cast %9 : vector<24xf32> to vector<24x1xf32>
    %11 = vector.broadcast %5 : vector<24x1xf32> to vector<24x32xf32>
    %12 = arith.subf %1, %11 : vector<24x32xf32>
    %13 = math.log %10 : vector<24x1xf32>
    %14 = vector.broadcast %13 : vector<24x1xf32> to vector<24x32xf32>
    %15 = arith.subf %12, %14 : vector<24x32xf32>
    %16 = tpu.reciprocal %10 : vector<24x1xf32> -> vector<24x1xf32>
    %17 = vector.broadcast %16 : vector<24x1xf32> to vector<24x32xf32>
    %18 = arith.mulf %8, %17 : vector<24x32xf32>
    %cst_5 = arith.constant dense<0xFF800000> : vector<24xf32>
    %19 = vector.multi_reduction <maximumf>, %3, %cst_5 [1] : vector<24x32xf32> to vector<24xf32>
    %20 = vector.shape_cast %19 : vector<24xf32> to vector<24x1xf32>
    %21 = vector.broadcast %20 : vector<24x1xf32> to vector<24x32xf32>
    %22 = arith.subf %3, %21 : vector<24x32xf32>
    %23 = math.exp %22 : vector<24x32xf32>
    %cst_6 = arith.constant dense<0.000000e+00> : vector<24xf32>
    %24 = vector.multi_reduction <add>, %23, %cst_6 [1] : vector<24x32xf32> to vector<24xf32>
    %25 = vector.shape_cast %24 : vector<24xf32> to vector<24x1xf32>
    %26 = tpu.reciprocal %25 : vector<24x1xf32> -> vector<24x1xf32>
    %27 = vector.broadcast %26 : vector<24x1xf32> to vector<24x32xf32>
    %28 = arith.mulf %23, %27 : vector<24x32xf32>
    %c0_7 = arith.constant 0 : index
    %c0_8 = arith.constant 0 : index
    %29 = vector.load %arg2[%c0_7, %c0_8] : memref<24x1xi32, #tpu.memory_space<vmem>>, vector<24x1xi32>
    %30 = tpu.iota {dimensions = array<i32: 1>} : vector<24x32xi32>
    %31 = vector.broadcast %29 : vector<24x1xi32> to vector<24x32xi32>
    %32 = arith.cmpi eq, %30, %31 : vector<24x32xi32>
    %cst_9 = arith.constant 0.000000e+00 : f32
    %33 = vector.broadcast %cst_9 : f32 to vector<24x32xf32>
    %34 = arith.select %32, %15, %33 : vector<24x32xi1>, vector<24x32xf32>
    %cst_10 = arith.constant 9.99999997E-7 : f32
    %35 = vector.broadcast %cst_10 : f32 to vector<24x32xf32>
    %36 = arith.addf %28, %35 : vector<24x32xf32>
    %37 = tpu.reciprocal %36 : vector<24x32xf32> -> vector<24x32xf32>
    %38 = arith.mulf %18, %37 : vector<24x32xf32>
    %cst_11 = arith.constant 9.99999997E-7 : f32
    %39 = vector.broadcast %cst_11 : f32 to vector<24x32xf32>
    %40 = arith.addf %39, %38 : vector<24x32xf32>
    %41 = math.log %40 : vector<24x32xf32>
    %42 = arith.mulf %18, %41 : vector<24x32xf32>
    %43 = arith.subf %42, %34 : vector<24x32xf32>
    %c24_i32 = arith.constant 24 : i32
    %44 = arith.muli %arg0, %c24_i32 : i32
    %45 = tpu.iota {dimensions = array<i32: 0>} : vector<24x1xi32>
    %46 = vector.broadcast %44 : i32 to vector<24x1xi32>
    %47 = arith.addi %46, %45 : vector<24x1xi32>
    %c20_i32 = arith.constant 20 : i32
    %48 = vector.broadcast %c20_i32 : i32 to vector<24x1xi32>
    %49 = arith.cmpi slt, %47, %48 : vector<24x1xi32>
    %cst_12 = arith.constant 0.000000e+00 : f32
    %50 = vector.shape_cast %49 : vector<24x1xi1> to vector<24x1xi1>
    %51 = vector.broadcast %50 : vector<24x1xi1> to vector<24x32xi1>
    %52 = vector.broadcast %cst_12 : f32 to vector<24x32xf32>
    %53 = arith.select %51, %43, %52 : vector<24x32xi1>, vector<24x32xf32>
    %cst_13 = arith.constant dense<0.000000e+00> : vector<32xf32>
    %54 = vector.multi_reduction <add>, %53, %cst_13 [0] : vector<24x32xf32> to vector<32xf32>
    %55 = vector.shape_cast %54 : vector<32xf32> to vector<1x32xf32>
    %c0_14 = arith.constant 0 : index
    %c0_15 = arith.constant 0 : index
    %c0_16 = arith.constant 0 : index
    %56 = vector.load %arg3[%c0_14, %c0_15, %c0_16] : memref<1x1x32xf32, #tpu.memory_space<vmem>>, vector<1x1x32xf32>
    %57 = vector.shape_cast %56 : vector<1x1x32xf32> to vector<1x32xf32>
    %58 = vector.shape_cast %55 : vector<1x32xf32> to vector<1x1x32xf32>
    tpu.vector_store %arg3[%c0_14, %c0_15, %c0_16], %58 {strides = array<i32>} : memref<1x1x32xf32, #tpu.memory_space<vmem>>, vector<1x1x32xf32>,
    return
  }
  func.func @transform_0(%arg0: i32) -> (i32, i32, i32) {
    %c0_i32 = arith.constant 0 : i32
    %c0_i32_0 = arith.constant 0 : i32
    %c0_i32_1 = arith.constant 0 : i32
    return %c0_i32, %arg0, %c0_i32_0 : i32, i32, i32
  }
  func.func @transform_1(%arg0: i32) -> (i32, i32) {
    %c0_i32 = arith.constant 0 : i32
    %c0_i32_0 = arith.constant 0 : i32
    return %arg0, %c0_i32 : i32, i32
  }
  func.func @transform_2(%arg0: i32) -> (i32, i32, i32) {
    %c0_i32 = arith.constant 0 : i32
    %c0_i32_0 = arith.constant 0 : i32
    %c0_i32_1 = arith.constant 0 : i32
    return %arg0, %c0_i32, %c0_i32_0 : i32, i32, i32
  }
}

</mosaic_0001>

<bundles_post_ra>
// kernel: tpu_custom_call.1
= control target key start
LH: loop header
LB: loop body
LE: loop exit
PB: predicated region body
PF: predicated region fallthrough
CT: control target
= control target key end

     0   :  { %7 = vsyncpa [#allocation3], 0  ;;  %s379_s0 = inlined_call_operand.hbm [shape: f32[2,24,32], index: 0, kind: input, shape index: {}]   ;;  %s380_s1 = inlined_call_operand.vmem [shape: s32[24,1], index: 1, kind: input, shape index: {}]   ;;  %s381_s2 = inlined_call_operand.hbm [shape: f32[1,1,32], index: 2, kind: output, shape index: {}]  }
   0x1   :  { %8 = vsyncpa [#allocation4], 0  ;;  %s299_s9 = smov [#allocation2]   ;;  %s251_s13 = scalar_lea.hbm %s379_s0, 768 }
   0x2   :  { %s14_s10 = sshll.u32 %s299_s9, 4  ;;  %p252_p0 = scmp.ne.s32.totalorder %s379_s0, %s251_s13  ;;  %s15_s10 = int_to_ptr.vmem [resolvable:$true] %s14_s10 }
   0x3   :  { %p255_p1 = scmp.lt.u32.totalorder %s251_s13, %s379_s0 }
   0x5   :  { %p257_p2 = pnand %p255_p1, %p252_p0 }
   0x7   :  { %260 = shalt.err (!%p257_p2)
}
   0x8   :  { %s261_s18 = scalar_lea.vmem %s15_s10, 768  ;;  %p266_p4 = scmp.lt.s32.totalorder %s15_s10, %s15_s10 }
   0x9   :  { %p262_p3 = scmp.ne.s32.totalorder %s15_s10, %s261_s18  ;;  %p267_p5 = scmp.lt.s32.totalorder %s261_s18, %s261_s18 }
   0xb   :  { %p268_p6 = por %p267_p5, %p266_p4 }
   0xd   :  { %p269_p7 = pnand %p268_p6, %p262_p3 }
   0xf   :  { %272 = shalt.err (!%p269_p7)
}
  0x10   :  { %s300_s19 = smov 128   ;;  %s301_s20 = smov 8  }
  0x11   :  { %20 = dma.hbm_to_vmem [thread:$0]  %s379_s0, 768, %s15_s10, [#allocation3], %s300_s19, %s300_s19, %s301_s20  }
  0x12   :  { %295 = dma.done.wait [#allocation3], 768  }
  0x13   :  { %296 = vsyncadd [#allocation3], 4294966528  ;;  %vm33_vm0 = vcmask 261120   ;;  %v30_v0 = vld [vmem:[#allocation2 + $0x18] sm:$0xff]  ;;  %v32_v1 = vld [vmem:[#allocation2 + $0x28] sm:$0xff]  ;;  %v302_v12 = vmov 0  }
  0x14   :  { %v31_v2 = vld [vmem:[#allocation2 + $0x20] sm:$0xff]  ;;  %v76_v3 = vsel %vm33_vm0, %v30_v0, -inf  ;;  %v82_v4 = vsel %vm33_vm0, %v32_v1, -inf  ;;  %v27_v8 = vld [vmem:[#allocation2 + $0x8] sm:$0xff]  ;;  %v28_v9 = vld [vmem:[#allocation2 + $0x10] sm:$0xff]  ;;  %208 = vset.pattern.permute.xlu1 %v302_v12  ;;  %207 = vset.pattern.permute.xlu0 %v302_v12  ;;  %vm185_vm5 = vcmask 253952  }
  0x15   :  { %v26_v5 = vld [vmem:[#allocation2] sm:$0xff]  ;;  %77 = vmax.xlane.f32.xlu0 %v76_v3  ;;  %83 = vmax.xlane.f32.xlu1 %v82_v4  ;;  %v79_v6 = vsel %vm33_vm0, %v31_v2, -inf  ;;  %v37_v10 = vsel %vm33_vm0, %v27_v8, -inf  ;;  %v40_v11 = vsel %vm33_vm0, %v28_v9, -inf  ;;  %v110_v43 = vld [vmem:[%s380_s1 + $0x8] sm:$0xff]  ;;  %v111_v45 = vld [vmem:[%s380_s1 + $0x10] sm:$0xff] }
  0x16   :  { %v34_v7 = vsel %vm33_vm0, %v26_v5, -inf  ;;  %v109_v44 = vld [vmem:[%s380_s1] sm:$0xff]  ;;  %s303_s1 = smov [#allocation5]  }
  0x17   :  { %s193_s28 = sshll.u32 %s303_s1, 4  ;;  %s194_s28 = int_to_ptr.vmem [resolvable:$true] %s193_s28 }
  0x18   :  { %s273_s29 = scalar_lea.vmem %s194_s28, 16  ;;  %s277_s30 = scalar_lea.vmem %s194_s28, 32 }
  0x19   :  { %80 = vmax.xlane.f32.xlu0 %v79_v6  ;;  %35 = vmax.xlane.f32.xlu1 %v34_v7  ;;  %p274_p8 = scmp.ne.s32.totalorder %s194_s28, %s273_s29  ;;  %p278_p9 = scmp.lt.s32.totalorder %s194_s28, %s194_s28 }
  0x1a   :  { %p279_p10 = scmp.lt.s32.totalorder %s277_s30, %s273_s29 }
  0x1c   :  { %p280_p11 = por %p279_p10, %p278_p9 }
  0x1d   :  { %38 = vmax.xlane.f32.xlu0 %v37_v10  ;;  %41 = vmax.xlane.f32.xlu1 %v40_v11 }
  0x1e   :  { %p281_p12 = pnand %p280_p11, %p274_p8 }
  0xa2   :  { %v78_v13 = vpop.xlane.xlu0 %77  ;;  %v84_v14 = vpop.xlane.xlu1 %83 }
  0xa3   :  { %v85_v15 = vsub.f32 %v30_v0, %v78_v13  ;;  %v87_v16 = vsub.f32 %v32_v1, %v84_v14  ;;  %v112_v13 = vlaneseq }
  0xa5   :  { %v88_v17 = vmul.f32 1.442695, %v85_v15  ;;  %v92_v18 = vmul.f32 1.442695, %v87_v16 }
  0xa6   :  { %v81_v19 = vpop.xlane.xlu0 %80  ;;  %v36_v20 = vpop.xlane.xlu1 %35 }
  0xa7   :  { %209 = vpow2.f32 %v88_v17  ;;  %v86_v21 = vsub.f32 %v31_v2, %v81_v19  ;;  %v337_v22 = vsub.f32 %v26_v5, %v36_v20  ;;  %v113_v20 = vand.u32 127, %v112_v13 }
  0xa8   :  { %211 = vpow2.f32 %v92_v18 }
  0xa9   :  { %v90_v23 = vmul.f32 1.442695, %v86_v21  ;;  %v46_v24 = vmul.f32 1.442695, %v337_v22  ;;  %v155_v21 = vshrl.u32 %v112_v13, 7 }
  0xaa   :  { %v39_v25 = vpop.xlane.xlu0 %38  ;;  %v42_v26 = vpop.xlane.xlu1 %41 }
  0xab   :  { %213 = vpow2.f32 %v90_v23  ;;  %v340_v27 = vsub.f32 %v27_v8, %v39_v25  ;;  %v342_v28 = vsub.f32 %v28_v9, %v42_v26 }
  0xac   :  { %215 = vpow2.f32 %v46_v24 }
  0xad   :  { %v48_v29 = vmul.f32 1.442695, %v340_v27  ;;  %v50_v30 = vmul.f32 1.442695, %v342_v28 }
  0xaf   :  { %217 = vpow2.f32 %v48_v29 }
  0xb0   :  { %219 = vpow2.f32 %v50_v30 }
  0xb1   :  { %v210_v31 = vpop.eup %209 }
  0xb2   :  { %v212_v32 = vpop.eup %211  ;;  %v94_v33 = vsel %vm33_vm0, %v210_v31, 0.0 }
  0xb3   :  { %95 = vadd.xlane.f32.xlu0 %v94_v33  ;;  %v100_v34 = vsel %vm33_vm0, %v212_v32, 0.0  ;;  %v157_v33 = vadd.s32 16, %v155_v21 }
  0xb5   :  { %v214_v35 = vpop.eup %213  ;;  %vm164_vm4 = vcmp.lt.s32.totalorder %v157_v33, 20 }
  0xb6   :  { %v216_v36 = vpop.eup %215  ;;  %v97_v37 = vsel %vm33_vm0, %v214_v35, 0.0 }
  0xb7   :  { %101 = vadd.xlane.f32.xlu0 %v100_v34  ;;  %98 = vadd.xlane.f32.xlu1 %v97_v37  ;;  %v52_v38 = vsel %vm33_vm0, %v216_v36, 0.0 }
  0xb9   :  { %v218_v39 = vpop.eup %217 }
  0xba   :  { %v220_v40 = vpop.eup %219  ;;  %v55_v41 = vsel %vm33_vm0, %v218_v39, 0.0 }
  0xbb   :  { %56 = vadd.xlane.f32.xlu0 %v55_v41  ;;  %53 = vadd.xlane.f32.xlu1 %v52_v38  ;;  %v58_v42 = vsel %vm33_vm0, %v220_v40, 0.0 }
  0xbf   :  { %59 = vadd.xlane.f32.xlu1 %v58_v42 }
  0xd0   :  { %118 = vperm.xlu1 %208, %v110_v43  }
  0xd1   :  { %115 = vperm.xlu0 %207, %v109_v44  }
  0xd4   :  { %121 = vperm.xlu1 %208, %v111_v45  }
 0x140   :  { %v96_v46 = vpop.xlane.xlu0 %95 }
 0x141   :  { %221 = vrcp.f32 %v96_v46 }
 0x144   :  { %v102_v47 = vpop.xlane.xlu0 %101  ;;  %v99_v48 = vpop.xlane.xlu1 %98 }
 0x145   :  { %223 = vrcp.f32 %v102_v47 }
 0x146   :  { %225 = vrcp.f32 %v99_v48 }
 0x148   :  { %v54_v49 = vpop.xlane.xlu1 %53  ;;  %v57_v54 = vpop.xlane.xlu0 %56 }
 0x149   :  { %227 = vrcp.f32 %v54_v49 }
 0x14b   :  { %v222_v50 = vpop.eup %221 }
 0x14c   :  { %v106_v51 = vmul.f32 %v222_v50, %v210_v31  ;;  %v60_v52 = vpop.xlane.xlu1 %59 }
 0x14d   :  { %229 = vrcp.f32 %v60_v52 }
 0x14e   :  { %v129_v53 = vadd.f32 1e-06, %v106_v51 }
 0x14f   :  { %v224_v55 = vpop.eup %223 }
 0x150   :  { %v226_v56 = vpop.eup %225  ;;  %231 = vrcp.f32 %v129_v53  ;;  %v108_v57 = vmul.f32 %v224_v55, %v212_v32  ;;  %v119_v14 = vpop.permute.xlu1 %118 }
 0x151   :  { %v107_v58 = vmul.f32 %v226_v56, %v214_v35  ;;  %233 = vrcp.f32 %v57_v54  ;;  %v116_v24 = vpop.permute.xlu0 %115  ;;  %vm124_vm3 = vcmp.eq.s32.totalorder %v113_v20, %v119_v14 }
 0x152   :  { %v131_v59 = vadd.f32 1e-06, %v108_v57  ;;  %vm123_vm1 = vcmp.eq.s32.totalorder %v113_v20, %v116_v24 }
 0x153   :  { %v130_v60 = vadd.f32 1e-06, %v107_v58  ;;  %v228_v61 = vpop.eup %227 }
 0x154   :  { %235 = vrcp.f32 %v131_v59  ;;  %v73_v63 = vmul.f32 %v228_v61, %v216_v36  ;;  %v122_v26 = vpop.permute.xlu1 %121 }
 0x155   :  { %237 = vrcp.f32 %v130_v60  ;;  %vm125_vm2 = vcmp.eq.s32.totalorder %v113_v20, %v122_v26 }
 0x156   :  { %239 = vlog2.f32 %v54_v49 }
 0x157   :  { %v230_v62 = vpop.eup %229  ;;  %241 = vlog2.f32 %v60_v52 }
 0x158   :  { %243 = vlog2.f32 %v57_v54  ;;  %v75_v4 = vmul.f32 %v230_v62, %v220_v40 }
 0x15a   :  { %v232_v0 = vpop.eup %231 }
 0x15b   :  { %v234_v1 = vpop.eup %233  ;;  %v135_v2 = vmul.f32 %v232_v0, %v73_v63 }
 0x15c   :  { %v74_v6 = vmul.f32 %v234_v1, %v218_v39 }
 0x15d   :  { %v138_v3 = vadd.f32 1e-06, %v135_v2 }
 0x15e   :  { %v236_v5 = vpop.eup %235 }
 0x15f   :  { %v238_v7 = vpop.eup %237  ;;  %245 = vlog2.f32 %v138_v3  ;;  %v137_v8 = vmul.f32 %v236_v5, %v75_v4 }
 0x160   :  { %v136_v9 = vmul.f32 %v238_v7, %v74_v6  ;;  %v240_v12 = vpop.eup %239 }
 0x161   :  { %v140_v10 = vadd.f32 1e-06, %v137_v8  ;;  %v242_v15 = vpop.eup %241  ;;  %v62_v17 = vmul.f32 0.6931472, %v240_v12 }
 0x162   :  { %v139_v11 = vadd.f32 1e-06, %v136_v9  ;;  %v244_v16 = vpop.eup %243  ;;  %v66_v19 = vmul.f32 0.6931472, %v242_v15 }
 0x163   :  { %247 = vlog2.f32 %v140_v10  ;;  %v64_v23 = vmul.f32 0.6931472, %v244_v16  ;;  %v67_v29 = vsub.f32 %v337_v22, %v62_v17 }
 0x164   :  { %249 = vlog2.f32 %v139_v11  ;;  %v69_v32 = vsub.f32 %v342_v28, %v66_v19 }
 0x165   :  { %v68_v35 = vsub.f32 %v340_v27, %v64_v23  ;;  %v126_v38 = vsel %vm123_vm1, %v67_v29, 0.0 }
 0x166   :  { %v128_v42 = vsel %vm125_vm2, %v69_v32, 0.0 }
 0x167   :  { %v127_v22 = vsel %vm124_vm3, %v68_v35, 0.0 }
 0x169   :  { %v246_v18 = vpop.eup %245 }
 0x16a   :  { %v142_v25 = vmul.f32 0.6931472, %v246_v18 }
 0x16c   :  { %v147_v31 = vmul.f32 %v142_v25, %v73_v63 }
 0x16d   :  { %v248_v30 = vpop.eup %247 }
 0x16e   :  { %v250_v34 = vpop.eup %249  ;;  %v146_v36 = vmul.f32 0.6931472, %v248_v30  ;;  %v150_v40 = vsub.f32 %v147_v31, %v126_v38 }
 0x16f   :  { %v144_v37 = vmul.f32 0.6931472, %v250_v34 }
 0x170   :  { %v149_v39 = vmul.f32 %v146_v36, %v75_v4  ;;  %v174_v28 = vsel %vm33_vm0, %v150_v40, 0.0 }
 0x171   :  { %v148_v41 = vmul.f32 %v144_v37, %v74_v6 }
 0x172   :  { %v152_v43 = vsub.f32 %v149_v39, %v128_v42 }
 0x173   :  { %v151_v44 = vsub.f32 %v148_v41, %v127_v22 }
 0x174   :  { %v173_v45 = vsel %vm164_vm4, %v152_v43, 0.0 }
 0x175   :  { %v175_v46 = vsel %vm33_vm0, %v151_v44, 0.0  ;;  %v177_v27 = vsel %vm33_vm0, %v173_v45, 0.0 }
 0x176   :  { %v176_v47 = vadd.f32 %v175_v46, %v174_v28 }
 0x178   :  { %v178_v48 = vadd.f32 %v177_v27, %v176_v47 }
 0x17a   :  { %v179_v49 = vrot.slane %v178_v48, 4 }
 0x17c   :  { %v180_v50 = vadd.f32 %v179_v49, %v178_v48 }
 0x17e   :  { %v181_v51 = vrot.slane %v180_v50, 2 }
 0x180   :  { %v182_v52 = vadd.f32 %v181_v51, %v180_v50 }
 0x182   :  { %v183_v53 = vrot.slane %v182_v52, 1 }
 0x184   :  { %v184_v54 = vadd.f32 %v183_v53, %v182_v52 }
 0x186   :  { %186 = vst.msk [vmem:[#allocation5] sm:$0x1] %vm185_vm5, %v184_v54 }
 0x187   :  { %284 = shalt.err (!%p281_p12)
}
 0x188   :  { %s285_s5 = scalar_lea.hbm %s381_s2, 16 }
 0x189   :  { %p286_p13 = scmp.ne.s32.totalorder %s381_s2, %s285_s5  ;;  %p289_p0 = scmp.lt.u32.totalorder %s285_s5, %s381_s2 }
 0x18b   :  { %p291_p1 = pnand %p289_p0, %p286_p13 }
 0x18d   :  { %294 = shalt.err (!%p291_p1)
}
 0x18e   :  { %196 = dma.vmem_to_hbm [thread:$0]  %s194_s28, 16, %s381_s2, [#allocation4]  }
 0x18f   :  { %297 = dma.done.wait [#allocation4], 16  }
 0x190   :  { %298 = vsyncadd [#allocation4], 4294967280 }
 0x191   :  { %200 = vsyncpa [#allocation3], 1 }
 0x192   :  { %201 = vsyncpa [#allocation4], 1 }

</bundles_post_ra>
